<compile_context>
chip_gen: v5e
topology: v5e:2x2
jax: 0.10.0
libtpu: 0.0.40
codegen_flags: <defaults>
</compile_context>

<pallas_src>
import functools

import jax
import jax.numpy as jnp
from jax import lax
from jax.experimental import pallas as pl
from jax.experimental.pallas import tpu as pltpu

EPS = 1e-5          # torch.nn.GroupNorm default eps
K = 7               # depthwise kernel size
P = 3               # padding
INV_SQRT2 = 0.7071067811865476


@functools.lru_cache(maxsize=None)
def _roll_is_numpy_convention() -> bool:
    """True iff pltpu.roll follows jnp.roll convention (result[j] = x[(j - shift) % n])."""
    def probe(x_ref, o_ref):
        o_ref[...] = pltpu.roll(x_ref[...], shift=1, axis=1)
    x = lax.broadcasted_iota(jnp.int32, (8, 128), 1)
    out = pl.pallas_call(probe, out_shape=jax.ShapeDtypeStruct((8, 128), jnp.int32))(x)
    return int(out[0, 0]) != 1


def block_kernel(x_ref, gamma_ref, beta_ref,
                 w1_ref, b1_ref, wd_ref, bd_ref, w2_ref, b2_ref,
                 o_ref, pad_ref, *, C, W, B, L0, roll_numpy):
    # x_ref block: (B, H, W*C); lane index = w*C + c.
    H = x_ref.shape[1]
    WC = W * C
    Wp = pad_ref.shape[-1]
    inv_n = 1.0 / (H * WC)

    gamma = gamma_ref[0]        # (WC,) params, tiled over W in the wrapper
    beta = beta_ref[0]
    b1 = b1_ref[0]
    bd = bd_ref[0]
    b2 = b2_ref[0]

    # ---- GroupNorm (groups=1): per-sample, two-pass variance (no cancellation) ----
    ys = []
    for b in range(B):
        xb = x_ref[b].astype(jnp.float32)                     # (H, WC)
        mean = jnp.sum(xb) * inv_n
        d = xb - mean
        var = jnp.sum(d * d) * inv_n                          # biased variance (torch)
        inv = lax.rsqrt(var + EPS)
        ys.append(d * (gamma * inv)[None, :] + beta[None, :])
    y = jnp.concatenate(ys, axis=0)                           # (B*H, WC)

    # ---- pw1: 1x1 conv as lane-dense block-diagonal bf16 matmul (MXU, f32 accumulate) ----
    y1 = jnp.dot(y.astype(jnp.bfloat16), w1_ref[...],
                 preferred_element_type=jnp.float32) + b1[None, :]

    # Tap lane offsets within a padded row, decomposed into a 128-aligned slice start (q*128)
    # and a residual lane shift r handled once per kh by an XLU roll.
    taps = []
    for kw in range(K):
        off = L0 - P * C + kw * C
        q, r = divmod(off, 128)
        taps.append((kw, q, r))
    rvals = sorted({r for _, _, r in taps})

    # ---- depthwise 7x7 conv (padding 3) ----
    accs = []
    for b in range(B):
        # Halo-only zeroing (interior is fully overwritten below). Done every step: the grid is
        # "parallel", so a pl.when(step==0) init would leave the other core's scratch stale.
        zrow = jnp.zeros((P, Wp), jnp.float32)
        pad_ref[b, pl.ds(0, P), :] = zrow                                   # top halo rows
        pad_ref[b, pl.ds(P + H, P), :] = zrow                               # bottom halo rows
        zcol = jnp.zeros((H, P * C), jnp.float32)
        pad_ref[b, pl.ds(P, H), pl.ds(L0 - P * C, P * C)] = zcol            # left halo lanes
        pad_ref[b, pl.ds(P, H), pl.ds(L0 + WC, P * C)] = zcol               # right halo lanes
        pad_ref[b, pl.ds(P, H), pl.ds(L0, WC)] = y1[b * H:(b + 1) * H, :]   # lane-aligned store

        acc = jnp.zeros((H, WC), jnp.float32)
        for kh in range(K):
            rows = pad_ref[b, pl.ds(kh, H), :]                # (H, Wp): one sublane realign / kh
            for r in rvals:
                if r == 0:
                    shifted = rows
                else:
                    # shift data left by r lanes: shifted[:, j] == rows[:, j + r]
                    s = (Wp - r) if roll_numpy else r
                    shifted = pltpu.roll(rows, shift=s, axis=1)
                for kw, q, rr in taps:
                    if rr != r:
                        continue
                    tap = shifted[:, q * 128:q * 128 + WC]    # vreg-aligned static slice
                    acc = acc + tap * wd_ref[kh * K + kw][None, :]
        accs.append(acc)
    acc = jnp.concatenate(accs, axis=0) + bd[None, :]         # (B*H, WC), bias added once

    # ---- GELU (tanh approximation -> EUP; erf would be a long VALU polynomial) ----
    g = jax.nn.gelu(acc, approximate=True)

    # ---- pw2: block-diagonal bf16 matmul + bias ----
    z = jnp.dot(g.astype(jnp.bfloat16), w2_ref[...],
                preferred_element_type=jnp.float32) + b2[None, :]

    # ---- residual: re-read x from the ref (no long live range) ----
    for b in range(B):
        o_ref[b] = (x_ref[b].astype(jnp.float32)
                    + z[b * H:(b + 1) * H, :]).astype(o_ref.dtype)


def _pick_batch_block(n, h, max_rows=256):
    b = max(1, min(n, max_rows // h))
    while n % b:
        b -= 1
    return b


def block_forward(x_nchw, gamma, beta, w1, b1, wd, bd, w2, b2):
    N, C, H, W = x_nchw.shape
    WC = W * C
    assert WC % 128 == 0, "lane-dense layout requires W*C to be a multiple of 128"
    assert H % 8 == 0

    B = _pick_batch_block(N, H)                  # samples per grid step (M = B*H rows for MXU)
    L0 = ((P * C + 127) // 128) * 128            # 128-aligned lane start of the interior
    Wp = ((L0 + WC + P * C + 127) // 128) * 128  # padded-row lane width (multiple of 128)

    # NCHW -> NHWC -> lane-dense (N, H, W*C)
    x = jnp.transpose(x_nchw, (0, 2, 3, 1)).reshape(N, H, WC)

    def tile_w(v):                               # (1, C) -> (1, W*C)
        return jnp.tile(v.reshape(1, C), (1, W)).astype(jnp.float32)

    gamma_t, beta_t = tile_w(gamma), tile_w(beta)
    b1_t, bd_t, b2_t = tile_w(b1), tile_w(bd), tile_w(b2)
    wd_t = jnp.tile(wd, (1, W)).astype(jnp.float32)            # (49, W*C)

    eye_w = jnp.eye(W, dtype=jnp.float32)
    w1_big = jnp.kron(eye_w, w1.astype(jnp.float32)).astype(jnp.bfloat16)  # (WC, WC) bf16
    w2_big = jnp.kron(eye_w, w2.astype(jnp.float32)).astype(jnp.bfloat16)

    roll_numpy = _roll_is_numpy_convention()

    out = pl.pallas_call(
        functools.partial(block_kernel, C=C, W=W, B=B, L0=L0, roll_numpy=roll_numpy),
        out_shape=jax.ShapeDtypeStruct((N, H, WC), x.dtype),
        grid_spec=pltpu.PrefetchScalarGridSpec(
            num_scalar_prefetch=0,
            grid=(N // B,),
            in_specs=[
                pl.BlockSpec((B, H, WC), lambda n: (n, 0, 0)),     # x (lane-dense, B samples)
                pl.BlockSpec((1, WC), lambda n: (0, 0)),           # gamma (tiled over W)
                pl.BlockSpec((1, WC), lambda n: (0, 0)),           # beta
                pl.BlockSpec((WC, WC), lambda n: (0, 0)),          # w1 block-diagonal (bf16)
                pl.BlockSpec((1, WC), lambda n: (0, 0)),           # b1
                pl.BlockSpec((K * K, WC), lambda n: (0, 0)),       # wd (49, W*C)
                pl.BlockSpec((1, WC), lambda n: (0, 0)),           # bd
                pl.BlockSpec((WC, WC), lambda n: (0, 0)),          # w2 block-diagonal (bf16)
                pl.BlockSpec((1, WC), lambda n: (0, 0)),           # b2
            ],
            out_specs=pl.BlockSpec((B, H, WC), lambda n: (n, 0, 0)),
            scratch_shapes=[pltpu.VMEM((B, H + 2 * P, Wp), jnp.float32)],
        ),
        compiler_params=pltpu.CompilerParams(
            dimension_semantics=("parallel",),           # batch blocks split across TensorCores
            vmem_limit_bytes=32 * 1024 * 1024,
        ),
    )(x, gamma_t, beta_t, w1_big, b1_t, wd_t, bd_t, w2_big, b2_t)

    return jnp.transpose(out.reshape(N, H, W, C), (0, 3, 1, 2))    # back to NCHW


def reference(x_nchw, gamma, beta, w1, b1, wd, bd, w2, b2):
    """Pure-JAX reference mirroring the PyTorch module (NCHW semantics, f32, exact GELU)."""
    N, C, H, W = x_nchw.shape
    x = jnp.transpose(x_nchw, (0, 2, 3, 1)).astype(jnp.float32)   # NHWC

    mean = jnp.mean(x, axis=(1, 2, 3), keepdims=True)
    var = jnp.mean((x - mean) ** 2, axis=(1, 2, 3), keepdims=True)
    y = (x - mean) * lax.rsqrt(var + EPS)
    y = y * gamma[0][None, None, None, :] + beta[0][None, None, None, :]

    y = jnp.einsum("nhwc,cd->nhwd", y, w1) + b1[0]

    wd4 = wd.reshape(K, K, 1, C)                                  # HWIO, depthwise
    y = lax.conv_general_dilated(
        y, wd4, window_strides=(1, 1), padding=((P, P), (P, P)),
        dimension_numbers=("NHWC", "HWIO", "NHWC"),
        feature_group_count=C) + bd[0]

    y = jax.nn.gelu(y, approximate=False)
    y = jnp.einsum("nhwc,cd->nhwd", y, w2) + b2[0]

    out = x + y
    return jnp.transpose(out, (0, 3, 1, 2))


if __name__ == "__main__":
    N, C, H, W = 2, 32, 16, 16        # d_model = 32
    key = jax.random.PRNGKey(0)
    ks = jax.random.split(key, 9)

    x = jax.random.normal(ks[0], (N, C, H, W), jnp.float32)

    # deterministic synthetic parameters (shapes follow the module's __init__)
    gamma = 1.0 + 0.1 * jax.random.normal(ks[1], (1, C), jnp.float32)
    beta = 0.1 * jax.random.normal(ks[2], (1, C), jnp.float32)
    w1 = jax.random.normal(ks[3], (C, C), jnp.float32) / jnp.sqrt(C)   # (Cin, Cout)
    b1 = 0.1 * jax.random.normal(ks[4], (1, C), jnp.float32)
    wd = jax.random.normal(ks[5], (K * K, C), jnp.float32) / (K * K)   # (kh*kw, C)
    bd = 0.1 * jax.random.normal(ks[6], (1, C), jnp.float32)
    w2 = jax.random.normal(ks[7], (C, C), jnp.float32) / jnp.sqrt(C)
    b2 = 0.1 * jax.random.normal(ks[8], (1, C), jnp.float32)

    out = block_forward(x, gamma, beta, w1, b1, wd, bd, w2, b2)
    out = jax.block_until_ready(out)

    ref = reference(x, gamma, beta, w1, b1, wd, bd, w2, b2)
    assert out.shape == (N, C, H, W)
    assert bool(jnp.all(jnp.isfinite(out)))
    # Tolerance covers bf16 MXU operands + tanh-approx GELU (per perf review); f32 reference.
    assert bool(jnp.allclose(out, ref, rtol=2e-3, atol=4e-3)), (
        "max abs diff = %s" % float(jnp.max(jnp.abs(out - ref))))

    print("KERNEL_OK")
</pallas_src>

<mosaic_0001>
module attributes {stable_mosaic.version = 11 : i64} {
  func.func @probe(%arg0: memref<8x128xi32, #tpu.memory_space<vmem>>, %arg1: memref<8x128xi32, #tpu.memory_space<vmem>>) attributes {dimension_semantics = [], scalar_prefetch = 0 : i64, scratch_operands = 0 : i64, tpu.core_type = #tpu.core_type<tc>} {
    %c0 = arith.constant 0 : index
    %c0_0 = arith.constant 0 : index
    %0 = vector.load %arg0[%c0, %c0_0] : memref<8x128xi32, #tpu.memory_space<vmem>>, vector<8x128xi32>
    %c1_i32 = arith.constant 1 : i32
    %1 = tpu.dynamic_rotate %0 by %c1_i32 dim 1 : vector<8x128xi32>, i32 -> vector<8x128xi32>
    %c0_1 = arith.constant 0 : index
    %c0_2 = arith.constant 0 : index
    %2 = vector.load %arg1[%c0_1, %c0_2] : memref<8x128xi32, #tpu.memory_space<vmem>>, vector<8x128xi32>
    tpu.vector_store %arg1[%c0_1, %c0_2], %1 {strides = array<i32>} : memref<8x128xi32, #tpu.memory_space<vmem>>, vector<8x128xi32>,
    return
  }
}

</mosaic_0001>

<bundles_post_ra>
// kernel: tpu_custom_call.1
= control target key start
LH: loop header
LB: loop body
LE: loop exit
PB: predicated region body
PF: predicated region fallthrough
CT: control target
= control target key end

     0   :  { %6 = vsyncpa [#allocation3], 0  ;;  %s118_s0 = inlined_call_operand.hbm [shape: s32[8,128], index: 0, kind: input, shape index: {}]   ;;  %s119_s1 = inlined_call_operand.hbm [shape: s32[8,128], index: 1, kind: output, shape index: {}]  }
   0x1   :  { %7 = vsyncpa [#allocation4], 0  ;;  %s13_s8 = sshll.u32 %s118_s0, 4  ;;  %s99_s9 = smov [#allocation2]   ;;  %s14_s8 = int_to_ptr.hbm [resolvable:$true] %s13_s8 }
   0x2   :  { %s15_s10 = sshll.u32 %s99_s9, 4  ;;  %s16_s10 = int_to_ptr.vmem [resolvable:$true] %s15_s10 }
   0x3   :  { %18 = dma.hbm_to_vmem [thread:$0]  %s14_s8, 128, %s16_s10, [#allocation3]  }
   0x4   :  { %95 = dma.done.wait [#allocation3], 128  }
   0x5   :  { %96 = vsyncadd [#allocation3], 4294967168  ;;  %v23_v0 = vld [vmem:[#allocation2] sm:$0xff]  ;;  %s100_s11 = smov 1   ;;  %s101_s12 = smov [#allocation5]  }
   0x6   :  { %24 = vrot.lane.b32.xlu0 %v23_v0, %s100_s11  ;;  %s32_s13 = sshll.u32 %s101_s12, 4  ;;  %s34_s16 = sshll.u32 %s119_s1, 4  ;;  %s33_s13 = int_to_ptr.vmem [resolvable:$true] %s32_s13  ;;  %s35_s16 = int_to_ptr.hbm [resolvable:$true] %s34_s16 }
  0x78   :  { %v25_v1 = vpop.permute.xlu0 %24 }
  0x79   :  { %26 = vst [vmem:[#allocation5] sm:$0xff] %v25_v1 }
  0x7a   :  { %37 = dma.vmem_to_hbm [thread:$0]  %s33_s13, 128, %s35_s16, [#allocation4]  }
  0x7b   :  { %97 = dma.done.wait [#allocation4], 128  }
  0x7c   :  { %98 = vsyncadd [#allocation4], 4294967168 }
  0x7d   :  { %42 = vsyncpa [#allocation3], 1 }
  0x7e   :  { %43 = vsyncpa [#allocation4], 1 }

</bundles_post_ra>
